<compile_context>
chip_gen: v7x
topology: tpu7x:2x2x1
jax: 0.10.0
libtpu: 0.0.40
codegen_flags: <defaults>
</compile_context>

<pallas_src>
import math

import jax
import jax.numpy as jnp
from jax import lax
from jax.experimental import pallas as pl
from jax.experimental.pallas import tpu as pltpu


def _round_up(a: int, b: int) -> int:
    return (a + b - 1) // b * b


def conv2d_static_same_padding(x_nchw, weight_oihw, bias, stride):
    """Forward pass of Conv2dStaticSamePadding (groups=1, dilation=1).

    x_nchw:      (N, Cin, H, W)  float32
    weight_oihw: (Cout, Cin, KH, KW)
    bias:        (Cout,)
    stride:      (sh, sw)
    returns:     out (N, Cout, OH, OW) float32, (top, bottom, left, right)
    """
    # TODO(synk): groups > 1 / dilation > 1 (non-default ctor args) not implemented.
    N, Cin, H, W = x_nchw.shape
    Cout, Cin_w, KH, KW = weight_oihw.shape
    assert Cin == Cin_w
    sh, sw = stride

    # ---- TF/Keras "SAME" padding (same arithmetic as the torch module). ----
    extra_h = (math.ceil(W / sw) - 1) * sw - W + KW
    extra_v = (math.ceil(H / sh) - 1) * sh - H + KH
    left = extra_h // 2
    right = extra_h - left
    top = extra_v // 2
    bottom = extra_v - top

    OH = (H + top + bottom - KH) // sh + 1
    OW = (W + left + right - KW) // sw + 1

    # ---- glue: NCHW -> NHWC, pad (negative pad == crop, matching F.pad). ----
    x = jnp.transpose(x_nchw, (0, 2, 3, 1)).astype(jnp.float32)
    x = jnp.pad(
        x,
        ((0, 0),
         (max(0, top), max(0, bottom)),
         (max(0, left), max(0, right)),
         (0, 0)))
    hp, wp = x.shape[1], x.shape[2]
    x = x[:,
          max(0, -top): hp - max(0, -bottom),
          max(0, -left): wp - max(0, -right),
          :]
    Hp, Wp = x.shape[1], x.shape[2]

    # ---- stride-phase split so the in-kernel im2col is unit-stride. --------
    # x_ph[n*PH + ph*sw + pw, i, j, c] == x_pad[n, i*sh + ph, j*sw + pw, c]
    # (XLA fuses transpose+pad+reshape into ~one copy; traffic == old NHWC pass.)
    Hps, Wps = _round_up(Hp, sh), _round_up(Wp, sw)
    x = jnp.pad(x, ((0, 0), (0, Hps - Hp), (0, Wps - Wp), (0, 0)))
    Hs, Ws = Hps // sh, Wps // sw
    PH = sh * sw
    x_ph = (x.reshape(N, Hs, sh, Ws, sw, Cin)
              .transpose(0, 2, 4, 1, 3, 5)
              .reshape(N * PH, Hs, Ws, Cin))

    # ---- weights: OIHW -> (K, Cout); K zero-padded to a lane multiple. -----
    # Tap (col) order is (kh, kw, cin), matching the in-kernel patch assembly.
    K = KH * KW * Cin
    K_pad = _round_up(K, 128)
    w_kc = jnp.transpose(weight_oihw, (2, 3, 1, 0)).reshape(K, Cout)
    w_kc = jnp.pad(w_kc.astype(jnp.float32), ((0, K_pad - K), (0, 0)))
    b_2d = bias.astype(jnp.float32).reshape(1, Cout)

    # ---- output packing: G pixels per lane-dense output row. ---------------
    M_img = OH * OW
    G = 1
    if Cout < 128:
        best_density = Cout / _round_up(Cout, 128)
        for g in range(2, min(128 // Cout, 64) + 1):
            if M_img % g:
                continue
            c = g * Cout
            d = c / _round_up(c, 128)
            if d > best_density + 1e-9:
                best_density, G = d, g
    C = G * Cout

    # ---- row-tile selection: divisor of OH, ~8 MiB patch-scratch budget. ---
    scratch_budget = 8 * 1024 * 1024
    feasible = []
    for t in range(1, OH + 1):
        if OH % t:
            continue
        m_t = t * OW
        if (OH // t) > 1 and (m_t % G != 0 or (m_t // G) % 8 != 0):
            continue  # multi-tile output blocks need 8-aligned packed rows
        feasible.append(t)
    within = [t for t in feasible if t * OW * K_pad * 4 <= scratch_budget]
    T_OH = max(within) if within else min(feasible)
    OH_T = OH // T_OH          # grid extent over output-row tiles (no tail pad)
    T_M = T_OH * OW            # output pixels per grid step
    R = T_M // G               # packed output rows per grid step
    # TODO(synk): strip-mine the input with manual make_async_copy when a full
    # phase-split image does not fit VMEM (very large feature maps).
    # TODO(synk): add a Cout ("parallel") grid axis + (K_pad, TN) weight blocks
    # when Cout is very large so the full weight slab need not be resident.

    # ---- VMEM budget (v7x: 64 MiB physical, v5e/v6e: 128 MiB physical). ----
    x_blk_bytes = PH * Hs * _round_up(Ws, 8) * _round_up(Cin, 128) * 4
    w_bytes = K_pad * _round_up(Cout, 128) * 4
    out_blk_bytes = _round_up(R, 8) * _round_up(C, 128) * 4
    scratch_bytes = T_M * K_pad * 4
    weights_big = w_bytes >= 2 * 1024 * 1024
    w_buffers = 1 if weights_big else 2
    need = (2 * x_blk_bytes + w_buffers * w_bytes + 2 * out_blk_bytes
            + scratch_bytes + (1 << 20))
    vmem_cap = 48 * 1024 * 1024                      # 3/4 of v7x physical
    try:
        vmem_cap = int(pltpu.get_tpu_info().vmem_capacity_bytes * 3 // 4)
    except Exception:
        pass
    vmem_limit = int(min(max(2 * need, 32 * 1024 * 1024),
                         max(vmem_cap, need + (1 << 20))))

    # Resident (never-changing) blocks: single-buffer them when big (v7x VMEM).
    if weights_big:
        w_spec = pl.BlockSpec((K_pad, Cout), lambda n, t: (0, 0),
                              pipeline_mode=pl.Buffered(1))
        b_spec = pl.BlockSpec((1, Cout), lambda n, t: (0, 0),
                              pipeline_mode=pl.Buffered(1))
    else:
        w_spec = pl.BlockSpec((K_pad, Cout), lambda n, t: (0, 0))
        b_spec = pl.BlockSpec((1, Cout), lambda n, t: (0, 0))

    def kernel(x_ref, w_ref, b_ref, o_ref, p_ref):
        # x_ref: (PH, Hs, Ws, Cin) f32  phase-split image, resident per batch elem
        # w_ref: (K_pad, Cout)     f32  resident weights (zero rows for K pad)
        # b_ref: (1, Cout)         f32  resident bias
        # o_ref: (1, R, C)         f32  packed, lane-dense output tile
        # p_ref: (T_M, K_pad)      f32  VMEM im2col patch scratch
        t = pl.program_id(1)

        if K_pad > K:
            @pl.when(t == 0)
            def _():
                # Zero the K-padding columns once per image.  The matching
                # weight rows are zero, but stale VMEM could hold NaNs, and
                # 0 * NaN = NaN, so the pad columns must not be garbage.
                p_ref[:, K:] = jnp.zeros((T_M, K_pad - K), jnp.float32)

        # In-kernel im2col: unit-stride loads from the phase-split image,
        # masked stores at static lane offsets into the patch scratch.
        oh0 = t * T_OH
        for kh in range(KH):
            for kw in range(KW):
                ph = (kh % sh) * sw + (kw % sw)
                tap = x_ref[ph,
                            pl.ds(oh0 + kh // sh, T_OH),
                            (kw // sw):(kw // sw) + OW,
                            :]                                # (T_OH, OW, Cin)
                col = (kh * KW + kw) * Cin
                p_ref[:, col:col + Cin] = tap.reshape(T_M, Cin)

        # One MXU GEMM per tile: (T_M, K_pad) @ (K_pad, Cout), f32 accumulate.
        acc = jnp.dot(p_ref[...], w_ref[...],
                      preferred_element_type=jnp.float32)     # (T_M, Cout)
        acc = acc + b_ref[...]

        # Pack G pixels per output row (lane-dense store):
        #   o[0, r, g*Cout + c] = pixel (g*R + r), channel c
        for g in range(G):
            o_ref[0, :, g * Cout:(g + 1) * Cout] = acc[g * R:(g + 1) * R, :]

    out_packed = pl.pallas_call(
        kernel,
        out_shape=jax.ShapeDtypeStruct((N, OH_T * R, C), jnp.float32),
        grid=(N, OH_T),
        in_specs=[
            # full phase-split image per batch element; index constant in t,
            # so it is DMA'd once per n and double-buffered across n.
            pl.BlockSpec((PH, Hs, Ws, Cin), lambda n, t: (n, 0, 0, 0)),
            w_spec,
            b_spec,
        ],
        out_specs=pl.BlockSpec((1, R, C), lambda n, t: (n, t, 0)),
        scratch_shapes=[pltpu.VMEM((T_M, K_pad), jnp.float32)],
        compiler_params=pltpu.CompilerParams(
            dimension_semantics=("parallel", "arbitrary"),
            vmem_limit_bytes=vmem_limit,
        ),
    )(x_ph, w_kc, b_2d)

    # ---- unpack (fused XLA reshape/transpose on the true-sized output). ----
    # out_packed[n, t*R + r, g*Cout + c] == pixel (t*T_M + g*R + r), channel c
    out = (out_packed.reshape(N, OH_T, R, G, Cout)
                     .transpose(0, 1, 3, 2, 4)
                     .reshape(N, OH, OW, Cout)
                     .transpose(0, 3, 1, 2))
    return out, (top, bottom, left, right)


if __name__ == "__main__":
    key = jax.random.PRNGKey(0)
    k_x, k_w, k_b = jax.random.split(key, 3)

    # Module config: in_channels=4, out_channels=8, kernel_size=3, stride=2, bias=True
    N, Cin, H, W = 2, 4, 16, 16
    Cout, KH, KW = 8, 3, 3
    stride = (2, 2)

    x = jax.random.normal(k_x, (N, Cin, H, W), dtype=jnp.float32)
    fan_in = Cin * KH * KW
    bound = 1.0 / math.sqrt(fan_in)
    weight = jax.random.uniform(k_w, (Cout, Cin, KH, KW),
                                minval=-bound, maxval=bound, dtype=jnp.float32)
    bias = jax.random.uniform(k_b, (Cout,),
                              minval=-bound, maxval=bound, dtype=jnp.float32)

    out, (top, bottom, left, right) = conv2d_static_same_padding(
        x, weight, bias, stride)
    out = jax.block_until_ready(out)

    # Full-precision f32 reference.  The kernel keeps f32 operands and f32
    # accumulation; the only remaining difference is the MXU's internal
    # f32-matmul pass precision, so use a small-but-safe tolerance.
    ref = lax.conv_general_dilated(
        x, weight, window_strides=stride,
        padding=((top, bottom), (left, right)),
        dimension_numbers=("NCHW", "OIHW", "NCHW"),
        precision=lax.Precision.HIGHEST,
    ) + bias[None, :, None, None]

    assert out.shape == ref.shape == (N, Cout, 8, 8)
    assert jnp.allclose(out, ref, atol=2e-2, rtol=2e-2), \
        float(jnp.max(jnp.abs(out - ref)))

    print("KERNEL_OK")
</pallas_src>

<mosaic_0001>
module attributes {stable_mosaic.version = 11 : i64} {
  func.func @kernel(%arg0: i32, %arg1: i32, %arg2: memref<4x9x9x4xf32, #tpu.memory_space<vmem>>, %arg3: memref<128x8xf32, #tpu.memory_space<vmem>>, %arg4: memref<1x8xf32, #tpu.memory_space<vmem>>, %arg5: memref<1x4x128xf32, #tpu.memory_space<vmem>>, %arg6: memref<64x128xf32, #tpu.memory_space<vmem>>) attributes {dimension_semantics = [#tpu.dimension_semantics<parallel>, #tpu.dimension_semantics<arbitrary>], iteration_bounds = array<i64: 2, 1>, scalar_prefetch = 0 : i64, scratch_operands = 1 : i64, tpu.core_type = #tpu.core_type<tc>, window_params = [{transform_indices = @transform_0, window_bounds = array<i64: 4, 9, 9, 4>}, {pipeline_mode = #tpu.pipeline_mode<synchronous>, transform_indices = @transform_1, window_bounds = array<i64: 128, 8>}, {pipeline_mode = #tpu.pipeline_mode<synchronous>, transform_indices = @transform_2, window_bounds = array<i64: 1, 8>}, {transform_indices = @transform_3, window_bounds = array<i64: 1, 4, 128>}]} {
    %c0_i32 = arith.constant 0 : i32
    %0 = arith.cmpi eq, %arg1, %c0_i32 : i32
    %1 = arith.extui %0 : i1 to i32
    %c0_i32_0 = arith.constant 0 : i32
    %2 = arith.cmpi ne, %1, %c0_i32_0 : i32
    scf.if %2 {
      %cst_85 = arith.constant 0.000000e+00 : f32
      %128 = vector.broadcast %cst_85 : f32 to vector<64x92xf32>
      %c0_86 = arith.constant 0 : index
      %c36 = arith.constant 36 : index
      %129 = vector.load %arg6[%c0_86, %c36] : memref<64x128xf32, #tpu.memory_space<vmem>>, vector<64x92xf32>
      tpu.vector_store %arg6[%c0_86, %c36], %128 {strides = array<i32>} : memref<64x128xf32, #tpu.memory_space<vmem>>, vector<64x92xf32>,
    } else {
    }
    %c8_i32 = arith.constant 8 : i32
    %3 = arith.muli %arg1, %c8_i32 : i32
    %c0_i32_1 = arith.constant 0 : i32
    %4 = arith.addi %3, %c0_i32_1 : i32
    %c0 = arith.constant 0 : index
    %5 = arith.index_cast %4 : i32 to index
    %c0_2 = arith.constant 0 : index
    %c0_3 = arith.constant 0 : index
    %6 = vector.load %arg2[%c0, %5, %c0_2, %c0_3] : memref<4x9x9x4xf32, #tpu.memory_space<vmem>>, vector<1x8x8x4xf32>
    %7 = vector.shape_cast %6 : vector<1x8x8x4xf32> to vector<8x8x4xf32>
    %8 = vector.shape_cast %7 : vector<8x8x4xf32> to vector<64x4xf32>
    %c0_4 = arith.constant 0 : index
    %c0_5 = arith.constant 0 : index
    %9 = vector.load %arg6[%c0_4, %c0_5] : memref<64x128xf32, #tpu.memory_space<vmem>>, vector<64x4xf32>
    tpu.vector_store %arg6[%c0_4, %c0_5], %8 {strides = array<i32>} : memref<64x128xf32, #tpu.memory_space<vmem>>, vector<64x4xf32>,
    %c0_i32_6 = arith.constant 0 : i32
    %10 = arith.addi %3, %c0_i32_6 : i32
    %c1 = arith.constant 1 : index
    %11 = arith.index_cast %10 : i32 to index
    %c0_7 = arith.constant 0 : index
    %c0_8 = arith.constant 0 : index
    %12 = vector.load %arg2[%c1, %11, %c0_7, %c0_8] : memref<4x9x9x4xf32, #tpu.memory_space<vmem>>, vector<1x8x8x4xf32>
    %13 = vector.shape_cast %12 : vector<1x8x8x4xf32> to vector<8x8x4xf32>
    %14 = vector.shape_cast %13 : vector<8x8x4xf32> to vector<64x4xf32>
    %c0_9 = arith.constant 0 : index
    %c4 = arith.constant 4 : index
    %15 = vector.load %arg6[%c0_9, %c4] : memref<64x128xf32, #tpu.memory_space<vmem>>, vector<64x4xf32>
    tpu.vector_store %arg6[%c0_9, %c4], %14 {strides = array<i32>} : memref<64x128xf32, #tpu.memory_space<vmem>>, vector<64x4xf32>,
    %c0_i32_10 = arith.constant 0 : i32
    %16 = arith.addi %3, %c0_i32_10 : i32
    %c0_11 = arith.constant 0 : index
    %17 = arith.index_cast %16 : i32 to index
    %c1_12 = arith.constant 1 : index
    %c0_13 = arith.constant 0 : index
    %18 = vector.load %arg2[%c0_11, %17, %c1_12, %c0_13] : memref<4x9x9x4xf32, #tpu.memory_space<vmem>>, vector<1x8x8x4xf32>
    %19 = vector.shape_cast %18 : vector<1x8x8x4xf32> to vector<8x8x4xf32>
    %20 = vector.shape_cast %19 : vector<8x8x4xf32> to vector<64x4xf32>
    %c0_14 = arith.constant 0 : index
    %c8 = arith.constant 8 : index
    %21 = vector.load %arg6[%c0_14, %c8] : memref<64x128xf32, #tpu.memory_space<vmem>>, vector<64x4xf32>
    tpu.vector_store %arg6[%c0_14, %c8], %20 {strides = array<i32>} : memref<64x128xf32, #tpu.memory_space<vmem>>, vector<64x4xf32>,
    %c0_i32_15 = arith.constant 0 : i32
    %22 = arith.addi %3, %c0_i32_15 : i32
    %c2 = arith.constant 2 : index
    %23 = arith.index_cast %22 : i32 to index
    %c0_16 = arith.constant 0 : index
    %c0_17 = arith.constant 0 : index
    %24 = vector.load %arg2[%c2, %23, %c0_16, %c0_17] : memref<4x9x9x4xf32, #tpu.memory_space<vmem>>, vector<1x8x8x4xf32>
    %25 = vector.shape_cast %24 : vector<1x8x8x4xf32> to vector<8x8x4xf32>
    %26 = vector.shape_cast %25 : vector<8x8x4xf32> to vector<64x4xf32>
    %c0_18 = arith.constant 0 : index
    %c12 = arith.constant 12 : index
    %27 = vector.load %arg6[%c0_18, %c12] : memref<64x128xf32, #tpu.memory_space<vmem>>, vector<64x4xf32>
    tpu.vector_store %arg6[%c0_18, %c12], %26 {strides = array<i32>} : memref<64x128xf32, #tpu.memory_space<vmem>>, vector<64x4xf32>,
    %c0_i32_19 = arith.constant 0 : i32
    %28 = arith.addi %3, %c0_i32_19 : i32
    %c3 = arith.constant 3 : index
    %29 = arith.index_cast %28 : i32 to index
    %c0_20 = arith.constant 0 : index
    %c0_21 = arith.constant 0 : index
    %30 = vector.load %arg2[%c3, %29, %c0_20, %c0_21] : memref<4x9x9x4xf32, #tpu.memory_space<vmem>>, vector<1x8x8x4xf32>
    %31 = vector.shape_cast %30 : vector<1x8x8x4xf32> to vector<8x8x4xf32>
    %32 = vector.shape_cast %31 : vector<8x8x4xf32> to vector<64x4xf32>
    %c0_22 = arith.constant 0 : index
    %c16 = arith.constant 16 : index
    %33 = vector.load %arg6[%c0_22, %c16] : memref<64x128xf32, #tpu.memory_space<vmem>>, vector<64x4xf32>
    tpu.vector_store %arg6[%c0_22, %c16], %32 {strides = array<i32>} : memref<64x128xf32, #tpu.memory_space<vmem>>, vector<64x4xf32>,
    %c0_i32_23 = arith.constant 0 : i32
    %34 = arith.addi %3, %c0_i32_23 : i32
    %c2_24 = arith.constant 2 : index
    %35 = arith.index_cast %34 : i32 to index
    %c1_25 = arith.constant 1 : index
    %c0_26 = arith.constant 0 : index
    %36 = vector.load %arg2[%c2_24, %35, %c1_25, %c0_26] : memref<4x9x9x4xf32, #tpu.memory_space<vmem>>, vector<1x8x8x4xf32>
    %37 = vector.shape_cast %36 : vector<1x8x8x4xf32> to vector<8x8x4xf32>
    %38 = vector.shape_cast %37 : vector<8x8x4xf32> to vector<64x4xf32>
    %c0_27 = arith.constant 0 : index
    %c20 = arith.constant 20 : index
    %39 = vector.load %arg6[%c0_27, %c20] : memref<64x128xf32, #tpu.memory_space<vmem>>, vector<64x4xf32>
    tpu.vector_store %arg6[%c0_27, %c20], %38 {strides = array<i32>} : memref<64x128xf32, #tpu.memory_space<vmem>>, vector<64x4xf32>,
    %c1_i32 = arith.constant 1 : i32
    %40 = arith.addi %3, %c1_i32 : i32
    %c0_28 = arith.constant 0 : index
    %41 = arith.index_cast %40 : i32 to index
    %c0_29 = arith.constant 0 : index
    %c0_30 = arith.constant 0 : index
    %42 = vector.load %arg2[%c0_28, %41, %c0_29, %c0_30] : memref<4x9x9x4xf32, #tpu.memory_space<vmem>>, vector<1x8x8x4xf32>
    %43 = vector.shape_cast %42 : vector<1x8x8x4xf32> to vector<8x8x4xf32>
    %44 = vector.shape_cast %43 : vector<8x8x4xf32> to vector<64x4xf32>
    %c0_31 = arith.constant 0 : index
    %c24 = arith.constant 24 : index
    %45 = vector.load %arg6[%c0_31, %c24] : memref<64x128xf32, #tpu.memory_space<vmem>>, vector<64x4xf32>
    tpu.vector_store %arg6[%c0_31, %c24], %44 {strides = array<i32>} : memref<64x128xf32, #tpu.memory_space<vmem>>, vector<64x4xf32>,
    %c1_i32_32 = arith.constant 1 : i32
    %46 = arith.addi %3, %c1_i32_32 : i32
    %c1_33 = arith.constant 1 : index
    %47 = arith.index_cast %46 : i32 to index
    %c0_34 = arith.constant 0 : index
    %c0_35 = arith.constant 0 : index
    %48 = vector.load %arg2[%c1_33, %47, %c0_34, %c0_35] : memref<4x9x9x4xf32, #tpu.memory_space<vmem>>, vector<1x8x8x4xf32>
    %49 = vector.shape_cast %48 : vector<1x8x8x4xf32> to vector<8x8x4xf32>
    %50 = vector.shape_cast %49 : vector<8x8x4xf32> to vector<64x4xf32>
    %c0_36 = arith.constant 0 : index
    %c28 = arith.constant 28 : index
    %51 = vector.load %arg6[%c0_36, %c28] : memref<64x128xf32, #tpu.memory_space<vmem>>, vector<64x4xf32>
    tpu.vector_store %arg6[%c0_36, %c28], %50 {strides = array<i32>} : memref<64x128xf32, #tpu.memory_space<vmem>>, vector<64x4xf32>,
    %c1_i32_37 = arith.constant 1 : i32
    %52 = arith.addi %3, %c1_i32_37 : i32
    %c0_38 = arith.constant 0 : index
    %53 = arith.index_cast %52 : i32 to index
    %c1_39 = arith.constant 1 : index
    %c0_40 = arith.constant 0 : index
    %54 = vector.load %arg2[%c0_38, %53, %c1_39, %c0_40] : memref<4x9x9x4xf32, #tpu.memory_space<vmem>>, vector<1x8x8x4xf32>
    %55 = vector.shape_cast %54 : vector<1x8x8x4xf32> to vector<8x8x4xf32>
    %56 = vector.shape_cast %55 : vector<8x8x4xf32> to vector<64x4xf32>
    %c0_41 = arith.constant 0 : index
    %c32 = arith.constant 32 : index
    %57 = vector.load %arg6[%c0_41, %c32] : memref<64x128xf32, #tpu.memory_space<vmem>>, vector<64x4xf32>
    tpu.vector_store %arg6[%c0_41, %c32], %56 {strides = array<i32>} : memref<64x128xf32, #tpu.memory_space<vmem>>, vector<64x4xf32>,
    %c0_42 = arith.constant 0 : index
    %c0_43 = arith.constant 0 : index
    %58 = vector.load %arg6[%c0_42, %c0_43] : memref<64x128xf32, #tpu.memory_space<vmem>>, vector<64x128xf32>
    %c0_44 = arith.constant 0 : index
    %c0_45 = arith.constant 0 : index
    %59 = vector.load %arg3[%c0_44, %c0_45] : memref<128x8xf32, #tpu.memory_space<vmem>>, vector<128x8xf32>
    %cst = arith.constant dense<0.000000e+00> : vector<64x8xf32>
    %60 = tpu.matmul %58, %59, %cst {dimension_numbers = #tpu.dot_dimension_numbers<[1], [0], [0], [1], [0, 0, 1, 1], [], []>} : vector<64x128xf32>, vector<128x8xf32>, vector<64x8xf32> -> vector<64x8xf32>
    %c0_46 = arith.constant 0 : index
    %c0_47 = arith.constant 0 : index
    %61 = vector.load %arg4[%c0_46, %c0_47] : memref<1x8xf32, #tpu.memory_space<vmem>>, vector<1x8xf32>
    %62 = vector.broadcast %61 : vector<1x8xf32> to vector<64x8xf32>
    %63 = arith.addf %60, %62 : vector<64x8xf32>
    %64 = vector.extract_strided_slice %63 {offsets = [0, 0], sizes = [4, 8], strides = [1, 1]} : vector<64x8xf32> to vector<4x8xf32>
    %c0_48 = arith.constant 0 : index
    %c0_49 = arith.constant 0 : index
    %c0_50 = arith.constant 0 : index
    %65 = vector.load %arg5[%c0_48, %c0_49, %c0_50] : memref<1x4x128xf32, #tpu.memory_space<vmem>>, vector<1x4x8xf32>
    %66 = vector.shape_cast %65 : vector<1x4x8xf32> to vector<4x8xf32>
    %67 = vector.shape_cast %64 : vector<4x8xf32> to vector<1x4x8xf32>
    tpu.vector_store %arg5[%c0_48, %c0_49, %c0_50], %67 {strides = array<i32>} : memref<1x4x128xf32, #tpu.memory_space<vmem>>, vector<1x4x8xf32>,
    %68 = vector.extract_strided_slice %63 {offsets = [4, 0], sizes = [4, 8], strides = [1, 1]} : vector<64x8xf32> to vector<4x8xf32>
    %c0_51 = arith.constant 0 : index
    %c0_52 = arith.constant 0 : index
    %c8_53 = arith.constant 8 : index
    %69 = vector.load %arg5[%c0_51, %c0_52, %c8_53] : memref<1x4x128xf32, #tpu.memory_space<vmem>>, vector<1x4x8xf32>
    %70 = vector.shape_cast %69 : vector<1x4x8xf32> to vector<4x8xf32>
    %71 = vector.shape_cast %68 : vector<4x8xf32> to vector<1x4x8xf32>
    tpu.vector_store %arg5[%c0_51, %c0_52, %c8_53], %71 {strides = array<i32>} : memref<1x4x128xf32, #tpu.memory_space<vmem>>, vector<1x4x8xf32>,
    %72 = vector.extract_strided_slice %63 {offsets = [8, 0], sizes = [4, 8], strides = [1, 1]} : vector<64x8xf32> to vector<4x8xf32>
    %c0_54 = arith.constant 0 : index
    %c0_55 = arith.constant 0 : index
    %c16_56 = arith.constant 16 : index
    %73 = vector.load %arg5[%c0_54, %c0_55, %c16_56] : memref<1x4x128xf32, #tpu.memory_space<vmem>>, vector<1x4x8xf32>
    %74 = vector.shape_cast %73 : vector<1x4x8xf32> to vector<4x8xf32>
    %75 = vector.shape_cast %72 : vector<4x8xf32> to vector<1x4x8xf32>
    tpu.vector_store %arg5[%c0_54, %c0_55, %c16_56], %75 {strides = array<i32>} : memref<1x4x128xf32, #tpu.memory_space<vmem>>, vector<1x4x8xf32>,
    %76 = vector.extract_strided_slice %63 {offsets = [12, 0], sizes = [4, 8], strides = [1, 1]} : vector<64x8xf32> to vector<4x8xf32>
    %c0_57 = arith.constant 0 : index
    %c0_58 = arith.constant 0 : index
    %c24_59 = arith.constant 24 : index
    %77 = vector.load %arg5[%c0_57, %c0_58, %c24_59] : memref<1x4x128xf32, #tpu.memory_space<vmem>>, vector<1x4x8xf32>
    %78 = vector.shape_cast %77 : vector<1x4x8xf32> to vector<4x8xf32>
    %79 = vector.shape_cast %76 : vector<4x8xf32> to vector<1x4x8xf32>
    tpu.vector_store %arg5[%c0_57, %c0_58, %c24_59], %79 {strides = array<i32>} : memref<1x4x128xf32, #tpu.memory_space<vmem>>, vector<1x4x8xf32>,
    %80 = vector.extract_strided_slice %63 {offsets = [16, 0], sizes = [4, 8], strides = [1, 1]} : vector<64x8xf32> to vector<4x8xf32>
    %c0_60 = arith.constant 0 : index
    %c0_61 = arith.constant 0 : index
    %c32_62 = arith.constant 32 : index
    %81 = vector.load %arg5[%c0_60, %c0_61, %c32_62] : memref<1x4x128xf32, #tpu.memory_space<vmem>>, vector<1x4x8xf32>
    %82 = vector.shape_cast %81 : vector<1x4x8xf32> to vector<4x8xf32>
    %83 = vector.shape_cast %80 : vector<4x8xf32> to vector<1x4x8xf32>
    tpu.vector_store %arg5[%c0_60, %c0_61, %c32_62], %83 {strides = array<i32>} : memref<1x4x128xf32, #tpu.memory_space<vmem>>, vector<1x4x8xf32>,
    %84 = vector.extract_strided_slice %63 {offsets = [20, 0], sizes = [4, 8], strides = [1, 1]} : vector<64x8xf32> to vector<4x8xf32>
    %c0_63 = arith.constant 0 : index
    %c0_64 = arith.constant 0 : index
    %c40 = arith.constant 40 : index
    %85 = vector.load %arg5[%c0_63, %c0_64, %c40] : memref<1x4x128xf32, #tpu.memory_space<vmem>>, vector<1x4x8xf32>
    %86 = vector.shape_cast %85 : vector<1x4x8xf32> to vector<4x8xf32>
    %87 = vector.shape_cast %84 : vector<4x8xf32> to vector<1x4x8xf32>
    tpu.vector_store %arg5[%c0_63, %c0_64, %c40], %87 {strides = array<i32>} : memref<1x4x128xf32, #tpu.memory_space<vmem>>, vector<1x4x8xf32>,
    %88 = vector.extract_strided_slice %63 {offsets = [24, 0], sizes = [4, 8], strides = [1, 1]} : vector<64x8xf32> to vector<4x8xf32>
    %c0_65 = arith.constant 0 : index
    %c0_66 = arith.constant 0 : index
    %c48 = arith.constant 48 : index
    %89 = vector.load %arg5[%c0_65, %c0_66, %c48] : memref<1x4x128xf32, #tpu.memory_space<vmem>>, vector<1x4x8xf32>
    %90 = vector.shape_cast %89 : vector<1x4x8xf32> to vector<4x8xf32>
    %91 = vector.shape_cast %88 : vector<4x8xf32> to vector<1x4x8xf32>
    tpu.vector_store %arg5[%c0_65, %c0_66, %c48], %91 {strides = array<i32>} : memref<1x4x128xf32, #tpu.memory_space<vmem>>, vector<1x4x8xf32>,
    %92 = vector.extract_strided_slice %63 {offsets = [28, 0], sizes = [4, 8], strides = [1, 1]} : vector<64x8xf32> to vector<4x8xf32>
    %c0_67 = arith.constant 0 : index
    %c0_68 = arith.constant 0 : index
    %c56 = arith.constant 56 : index
    %93 = vector.load %arg5[%c0_67, %c0_68, %c56] : memref<1x4x128xf32, #tpu.memory_space<vmem>>, vector<1x4x8xf32>
    %94 = vector.shape_cast %93 : vector<1x4x8xf32> to vector<4x8xf32>
    %95 = vector.shape_cast %92 : vector<4x8xf32> to vector<1x4x8xf32>
    tpu.vector_store %arg5[%c0_67, %c0_68, %c56], %95 {strides = array<i32>} : memref<1x4x128xf32, #tpu.memory_space<vmem>>, vector<1x4x8xf32>,
    %96 = vector.extract_strided_slice %63 {offsets = [32, 0], sizes = [4, 8], strides = [1, 1]} : vector<64x8xf32> to vector<4x8xf32>
    %c0_69 = arith.constant 0 : index
    %c0_70 = arith.constant 0 : index
    %c64 = arith.constant 64 : index
    %97 = vector.load %arg5[%c0_69, %c0_70, %c64] : memref<1x4x128xf32, #tpu.memory_space<vmem>>, vector<1x4x8xf32>
    %98 = vector.shape_cast %97 : vector<1x4x8xf32> to vector<4x8xf32>
    %99 = vector.shape_cast %96 : vector<4x8xf32> to vector<1x4x8xf32>
    tpu.vector_store %arg5[%c0_69, %c0_70, %c64], %99 {strides = array<i32>} : memref<1x4x128xf32, #tpu.memory_space<vmem>>, vector<1x4x8xf32>,
    %100 = vector.extract_strided_slice %63 {offsets = [36, 0], sizes = [4, 8], strides = [1, 1]} : vector<64x8xf32> to vector<4x8xf32>
    %c0_71 = arith.constant 0 : index
    %c0_72 = arith.constant 0 : index
    %c72 = arith.constant 72 : index
    %101 = vector.load %arg5[%c0_71, %c0_72, %c72] : memref<1x4x128xf32, #tpu.memory_space<vmem>>, vector<1x4x8xf32>
    %102 = vector.shape_cast %101 : vector<1x4x8xf32> to vector<4x8xf32>
    %103 = vector.shape_cast %100 : vector<4x8xf32> to vector<1x4x8xf32>
    tpu.vector_store %arg5[%c0_71, %c0_72, %c72], %103 {strides = array<i32>} : memref<1x4x128xf32, #tpu.memory_space<vmem>>, vector<1x4x8xf32>,
    %104 = vector.extract_strided_slice %63 {offsets = [40, 0], sizes = [4, 8], strides = [1, 1]} : vector<64x8xf32> to vector<4x8xf32>
    %c0_73 = arith.constant 0 : index
    %c0_74 = arith.constant 0 : index
    %c80 = arith.constant 80 : index
    %105 = vector.load %arg5[%c0_73, %c0_74, %c80] : memref<1x4x128xf32, #tpu.memory_space<vmem>>, vector<1x4x8xf32>
    %106 = vector.shape_cast %105 : vector<1x4x8xf32> to vector<4x8xf32>
    %107 = vector.shape_cast %104 : vector<4x8xf32> to vector<1x4x8xf32>
    tpu.vector_store %arg5[%c0_73, %c0_74, %c80], %107 {strides = array<i32>} : memref<1x4x128xf32, #tpu.memory_space<vmem>>, vector<1x4x8xf32>,
    %108 = vector.extract_strided_slice %63 {offsets = [44, 0], sizes = [4, 8], strides = [1, 1]} : vector<64x8xf32> to vector<4x8xf32>
    %c0_75 = arith.constant 0 : index
    %c0_76 = arith.constant 0 : index
    %c88 = arith.constant 88 : index
    %109 = vector.load %arg5[%c0_75, %c0_76, %c88] : memref<1x4x128xf32, #tpu.memory_space<vmem>>, vector<1x4x8xf32>
    %110 = vector.shape_cast %109 : vector<1x4x8xf32> to vector<4x8xf32>
    %111 = vector.shape_cast %108 : vector<4x8xf32> to vector<1x4x8xf32>
    tpu.vector_store %arg5[%c0_75, %c0_76, %c88], %111 {strides = array<i32>} : memref<1x4x128xf32, #tpu.memory_space<vmem>>, vector<1x4x8xf32>,
    %112 = vector.extract_strided_slice %63 {offsets = [48, 0], sizes = [4, 8], strides = [1, 1]} : vector<64x8xf32> to vector<4x8xf32>
    %c0_77 = arith.constant 0 : index
    %c0_78 = arith.constant 0 : index
    %c96 = arith.constant 96 : index
    %113 = vector.load %arg5[%c0_77, %c0_78, %c96] : memref<1x4x128xf32, #tpu.memory_space<vmem>>, vector<1x4x8xf32>
    %114 = vector.shape_cast %113 : vector<1x4x8xf32> to vector<4x8xf32>
    %115 = vector.shape_cast %112 : vector<4x8xf32> to vector<1x4x8xf32>
    tpu.vector_store %arg5[%c0_77, %c0_78, %c96], %115 {strides = array<i32>} : memref<1x4x128xf32, #tpu.memory_space<vmem>>, vector<1x4x8xf32>,
    %116 = vector.extract_strided_slice %63 {offsets = [52, 0], sizes = [4, 8], strides = [1, 1]} : vector<64x8xf32> to vector<4x8xf32>
    %c0_79 = arith.constant 0 : index
    %c0_80 = arith.constant 0 : index
    %c104 = arith.constant 104 : index
    %117 = vector.load %arg5[%c0_79, %c0_80, %c104] : memref<1x4x128xf32, #tpu.memory_space<vmem>>, vector<1x4x8xf32>
    %118 = vector.shape_cast %117 : vector<1x4x8xf32> to vector<4x8xf32>
    %119 = vector.shape_cast %116 : vector<4x8xf32> to vector<1x4x8xf32>
    tpu.vector_store %arg5[%c0_79, %c0_80, %c104], %119 {strides = array<i32>} : memref<1x4x128xf32, #tpu.memory_space<vmem>>, vector<1x4x8xf32>,
    %120 = vector.extract_strided_slice %63 {offsets = [56, 0], sizes = [4, 8], strides = [1, 1]} : vector<64x8xf32> to vector<4x8xf32>
    %c0_81 = arith.constant 0 : index
    %c0_82 = arith.constant 0 : index
    %c112 = arith.constant 112 : index
    %121 = vector.load %arg5[%c0_81, %c0_82, %c112] : memref<1x4x128xf32, #tpu.memory_space<vmem>>, vector<1x4x8xf32>
    %122 = vector.shape_cast %121 : vector<1x4x8xf32> to vector<4x8xf32>
    %123 = vector.shape_cast %120 : vector<4x8xf32> to vector<1x4x8xf32>
    tpu.vector_store %arg5[%c0_81, %c0_82, %c112], %123 {strides = array<i32>} : memref<1x4x128xf32, #tpu.memory_space<vmem>>, vector<1x4x8xf32>,
    %124 = vector.extract_strided_slice %63 {offsets = [60, 0], sizes = [4, 8], strides = [1, 1]} : vector<64x8xf32> to vector<4x8xf32>
    %c0_83 = arith.constant 0 : index
    %c0_84 = arith.constant 0 : index
    %c120 = arith.constant 120 : index
    %125 = vector.load %arg5[%c0_83, %c0_84, %c120] : memref<1x4x128xf32, #tpu.memory_space<vmem>>, vector<1x4x8xf32>
    %126 = vector.shape_cast %125 : vector<1x4x8xf32> to vector<4x8xf32>
    %127 = vector.shape_cast %124 : vector<4x8xf32> to vector<1x4x8xf32>
    tpu.vector_store %arg5[%c0_83, %c0_84, %c120], %127 {strides = array<i32>} : memref<1x4x128xf32, #tpu.memory_space<vmem>>, vector<1x4x8xf32>,
    return
  }
  func.func @transform_0(%arg0: i32, %arg1: i32) -> (i32, i32, i32, i32) {
    %c0_i32 = arith.constant 0 : i32
    %c0_i32_0 = arith.constant 0 : i32
    %c0_i32_1 = arith.constant 0 : i32
    %c0_i32_2 = arith.constant 0 : i32
    return %arg0, %c0_i32, %c0_i32_0, %c0_i32_1 : i32, i32, i32, i32
  }
  func.func @transform_1(%arg0: i32, %arg1: i32) -> (i32, i32) {
    %c0_i32 = arith.constant 0 : i32
    %c0_i32_0 = arith.constant 0 : i32
    %c0_i32_1 = arith.constant 0 : i32
    return %c0_i32, %c0_i32_0 : i32, i32
  }
  func.func @transform_2(%arg0: i32, %arg1: i32) -> (i32, i32) {
    %c0_i32 = arith.constant 0 : i32
    %c0_i32_0 = arith.constant 0 : i32
    %c0_i32_1 = arith.constant 0 : i32
    return %c0_i32, %c0_i32_0 : i32, i32
  }
  func.func @transform_3(%arg0: i32, %arg1: i32) -> (i32, i32, i32) {
    %c0_i32 = arith.constant 0 : i32
    %c0_i32_0 = arith.constant 0 : i32
    return %arg0, %arg1, %c0_i32 : i32, i32, i32
  }
}

</mosaic_0001>

<bundles_post_ra>
// kernel: tpu_custom_call.1
= control target key start
LH: loop header
LB: loop body
LE: loop exit
PB: predicated region body
PF: predicated region fallthrough
CT: control target
= control target key end

     0   :  { %8 = vsyncpa [#allocation4], 0  ;;  %s1755_s0 = inlined_call_operand.vmem [shape: f32[8,9,9,4], index: 0, kind: input, shape index: {}]   ;;  %s1756_s1 = inlined_call_operand.vmem [shape: f32[128,8], index: 1, kind: input, shape index: {}]   ;;  %s1757_s2 = inlined_call_operand.vmem [shape: f32[1,8], index: 2, kind: input, shape index: {}]   ;;  %s1758_s3 = inlined_call_operand.hbm [shape: f32[2,4,128], index: 3, kind: output, shape index: {}]  }
   0x1   :  { %10 = vsyncpa [#allocation4 + $0x1], 0  ;;  %s1329_s12 = smov 0   ;;  %s1331_s13 = smov 0  }
   0x2   :  { %s1333_s14 = smov 0   ;;  %s1335_s15 = smov 0  }
   0x3   :  { %s1337_s16 = smov 0   ;;  %s1339_s17 = smov 0  }
   0x4 LB: > { %s947_s18 = sadd.s32 4294967295, %s1286_s17   ;;  %s948_s19 = sadd.s32 4294967294, %s1286_s17   ;;  %s1286_s17 = sphi %s1339_s17, %s16_s17   ;;  %s1282_s16 = sphi %s1337_s16, %s1765_s16   ;;  %s1278_s15 = sphi %s1335_s15, %s1764_s15   ;;  %s1274_s14 = sphi %s1333_s14, %s1763_s14   ;;  %s1270_s13 = sphi %s1331_s13, %s1762_s13   ;;  %s1266_s12 = sphi %s1329_s12, %s1761_s12  }
   0x5   : > { %s28_s20 = sadd.s32 1, %s1282_s16  ;;  %s105_s21 = sadd.s32 1, %s1274_s14 }
   0x6   : > { %p30_p0 = scmp.ge.s32.totalorder %s28_s20, 2  ;;  %p115_p1 = scmp.ne.s32.totalorder %s1274_s14, %s1270_s13 }
   0x7   : > { %p116_p2 = scmp.eq.s32.totalorder %s947_s18, 1  ;;  %p121_p3 = scmp.ne.s32.totalorder %s1270_s13, %s1266_s12 }
   0x8   : > { %s1767_s20 = smov (%p30_p0, %s28_s20), 0  ;;  %p122_p5 = scmp.eq.s32.totalorder %s948_s19, 1 }
   0x9   : > { %p1369_p4 = por %p116_p2, %p115_p1  ;;  %s100_s23 = ssub.s32 %s1282_s16, %s1767_s20 }
   0xa   : > { %p951_p6 = scmp.ge.s32.totalorder %s1286_s17, 1  ;;  %p103_p7 = scmp.eq.s32.totalorder %s100_s23, 0 }
   0xb   : > { %p1376_p8 = por %p122_p5, %p121_p3  ;;  %p156_p9 = scmp.lt.s32.totalorder %s1286_s17, 3 }
   0xc   : > { %s1382_s25 = scalar_select %p103_p7, %s1274_s14, %s105_s21  }
   0xd   : > { %p157_p10 = pnand %p951_p6, %p156_p9 }
   0xe   : > { %s953_s26 = sshll.u32 (!%p157_p10), %s1278_s15, 2  ;;  %vm192_vm0 = vcmask (!%p157_p10), 1047840   ;;  %v1288_v0 = vmov (!%p157_p10), 0.0   ;;  %s1289_s4 = smov (!%p157_p10), 8   ;;  %vm212_vm1 = vcmask (!%p157_p10), 31744   ;;  %v632_v21 = vld [vmem:[%s1756_s1] sm:$0xff] (!%p157_p10) }
   0xf   : > { %160 = sbr.rel (%p157_p10) target bundleno = 627 (0x273), region = 32  ;;  %p182_p11 = scmp.lt.s32.totalorder (!%p157_p10), %s953_s26, 7  ;;  %193 = vst.msk [vmem:[#allocation2] sm:$0xff] (!%p157_p10), %vm192_vm0, %v1288_v0  ;;  %194 = vst.msk [vmem:[#allocation2 + $0x8] sm:$0xff] (!%p157_p10), %vm192_vm0, %v1288_v0  ;;  %v633_v22 = vld [vmem:[%s1756_s1 + $0x8] sm:$0xff] (!%p157_p10)  ;;  %v634_v23 = vld [vmem:[%s1756_s1 + $0x10] sm:$0xff] (!%p157_p10) }
  0x10   : > { %195 = vst.msk [vmem:[#allocation2 + $0x10] sm:$0xff] (!%p157_p10), %vm192_vm0, %v1288_v0  ;;  %196 = vst.msk [vmem:[#allocation2 + $0x18] sm:$0xff] (!%p157_p10), %vm192_vm0, %v1288_v0  ;;  %s1290_s5 = smov (!%p157_p10), 4   ;;  %s1291_s6 = smov (!%p157_p10), 12   ;;  %v635_v24 = vld [vmem:[%s1756_s1 + $0x18] sm:$0xff] (!%p157_p10)  ;;  %v1084_v25 = vpack.c.bf16 (!%p157_p10), %v633_v22, %v632_v21  ;;  %v636_v27 = vld [vmem:[%s1756_s1 + $0x20] sm:$0xff] (!%p157_p10) }
  0x11   : > { %197 = vst.msk [vmem:[#allocation2 + $0x20] sm:$0xff] (!%p157_p10), %vm192_vm0, %v1288_v0  ;;  %198 = vst.msk [vmem:[#allocation2 + $0x28] sm:$0xff] (!%p157_p10), %vm192_vm0, %v1288_v0  ;;  %s1292_s7 = smov (!%p157_p10), 16   ;;  %s1293_s8 = smov (!%p157_p10), 20   ;;  %v1088_v26 = vpack.c.bf16 (!%p157_p10), %v635_v24, %v634_v23  ;;  %v637_v28 = vld [vmem:[%s1756_s1 + $0x28] sm:$0xff] (!%p157_p10)  ;;  %v638_v31 = vld [vmem:[%s1756_s1 + $0x30] sm:$0xff] (!%p157_p10) }
  0x12   : > { %199 = vst.msk [vmem:[#allocation2 + $0x30] sm:$0xff] (!%p157_p10), %vm192_vm0, %v1288_v0  ;;  %200 = vst.msk [vmem:[#allocation2 + $0x38] sm:$0xff] (!%p157_p10), %vm192_vm0, %v1288_v0  ;;  %1085 = vmatprep.subr.bf16.mxu0 (!%p157_p10), %v1084_v25  ;;  %1116 = vmatprep.subr.bf16.mxu1 (!%p157_p10), %v1084_v25  ;;  %v1092_v30 = vpack.c.bf16 (!%p157_p10), %v637_v28, %v636_v27  ;;  %s1294_s10 = smov (!%p157_p10), 24   ;;  %v639_v32 = vld [vmem:[%s1756_s1 + $0x38] sm:$0xff] (!%p157_p10)  ;;  %v640_v36 = vld [vmem:[%s1756_s1 + $0x40] sm:$0xff] (!%p157_p10)  ;;  %s1295_s29 = smov (!%p157_p10), 28  }
  0x13   : > { %1087 = vmatpush3.bf16.msra.mxu0 (!%p157_p10), %v1084_v25  ;;  %1124 = vmatpush3.bf16.msra.mxu1 (!%p157_p10), %v1084_v25  ;;  %v1096_v35 = vpack.c.bf16 (!%p157_p10), %v639_v32, %v638_v31  ;;  %v641_v37 = vld [vmem:[%s1756_s1 + $0x48] sm:$0xff] (!%p157_p10)  ;;  %v642_v39 = vld [vmem:[%s1756_s1 + $0x50] sm:$0xff] (!%p157_p10)  ;;  %v643_v40 = vld [vmem:[%s1756_s1 + $0x58] sm:$0xff] (!%p157_p10)  ;;  %s1296_s28 = smov (!%p157_p10), 32   ;;  %vm263_vm2 = vcmask (!%p157_p10), 64544   ;;  %vm312_vm3 = vcmask (!%p157_p10), 97344  }
  0x14   : > { %1089 = vmatprep.subr.bf16.mxu0 (!%p157_p10), %v1088_v26  ;;  %1117 = vmatprep.subr.bf16.mxu1 (!%p157_p10), %v1088_v26  ;;  %v1100_v38 = vpack.c.bf16 (!%p157_p10), %v641_v37, %v640_v36  ;;  %v1104_v43 = vpack.c.bf16 (!%p157_p10), %v643_v40, %v642_v39  ;;  %v644_v44 = vld [vmem:[%s1756_s1 + $0x60] sm:$0xff] (!%p157_p10)  ;;  %v645_v45 = vld [vmem:[%s1756_s1 + $0x68] sm:$0xff] (!%p157_p10)  ;;  %v646_v47 = vld [vmem:[%s1756_s1 + $0x70] sm:$0xff] (!%p157_p10)  ;;  %vm363_vm4 = vcmask (!%p157_p10), 130144   ;;  %vm414_vm5 = vcmask (!%p157_p10), 162944   ;;  %s1297_s21 = smov (!%p157_p10), 64  }
  0x15   : > { %v1108_v46 = vpack.c.bf16 (!%p157_p10), %v645_v45, %v644_v44  ;;  %v647_v48 = vld [vmem:[%s1756_s1 + $0x78] sm:$0xff] (!%p157_p10)  ;;  %vm463_vm6 = vcmask (!%p157_p10), 195744   ;;  %vm515_vm7 = vcmask (!%p157_p10), 228544   ;;  %vm566_vm8 = vcmask (!%p157_p10), 261344   ;;  %s1298_s23 = smov (!%p157_p10), 72   ;;  %s1304_s9 = smov (!%p157_p10), 96  }
  0x16   : > { %s1769_s26 = smov (!%p182_p11, %s953_s26), 7  ;;  %v1112_v51 = vpack.c.bf16 %v647_v48, %v646_v47  ;;  %vm615_vm9 = vcmask 294144   ;;  %vm760_vm10 = vcmask 60416   ;;  %s1305_s11 = smov 104   ;;  %vm766_vm11 = vcmask 130116  }
  0x17   : > { %s1132_s27 = smul.u32 144, %s1769_s26  ;;  %1091 = vmatpush3.bf16.msra.mxu0 %v1088_v26  ;;  %1125 = vmatpush3.bf16.msra.mxu1 %v1088_v26  ;;  %s1299_s26 = smov 48   ;;  %vm772_vm12 = vcmask 191616   ;;  %vm777_vm13 = vcmask 261316   ;;  %vm783_vm14 = vcmask 322816   ;;  %vm788_vm15 = vcmask 392516  }
  0x18   : > { %1093 = vmatprep.subr.bf16.mxu0 %v1092_v30  ;;  %1118 = vmatprep.subr.bf16.mxu1 %v1092_v30  ;;  %s1306_s18 = smov 112   ;;  %vm794_vm0 = vcmask 454016   ;;  %s1013_s19 = sshll.u32 %s1278_s15, 6 }
  0x19   : > { %s1388_s30 = scalar_lea.vmem %s1755_s0, %s1132_s27  ;;  %s1303_s27 = smov 88  }
  0x1a   : > { %v272_v1 = vld [vmem:[%s1388_s30 + $0x1] sm:$0xff]  ;;  %v955_v2 = vld [vmem:[%s1388_s30 + $0x90] sm:$0xff] }
  0x1b   : > { %288 = vrot.lane.b32.xlu1 %v272_v1, %s1289_s4  ;;  %239 = vrot.lane.b32.xlu0 %v955_v2, %s1290_s5  ;;  %v1395_v3 = vld [vmem:[%s1388_s30 + $0x11] sm:$0xff]  ;;  %v1398_v4 = vld [vmem:[%s1388_s30 + $0xa0] sm:$0xff] }
  0x1c   : > { %v987_v5 = vld [vmem:[%s1388_s30 + $0x10] sm:$0xff]  ;;  %v963_v7 = vld [vmem:[%s1388_s30 + $0x120] sm:$0xff]  ;;  %1095 = vmatpush3.bf16.msra.mxu0 %v1092_v30  ;;  %1126 = vmatpush3.bf16.msra.mxu1 %v1092_v30 }
  0x1d   : > { %214 = vst.msk [vmem:[#allocation2 + $0x8] sm:$0xff] %vm212_vm1, %v987_v5  ;;  %v964_v6 = vld [vmem:[%s1388_s30 + $0x130] sm:$0xff]  ;;  %v1409_v8 = vld [vmem:[%s1388_s30 + $0x20] sm:$0xff]  ;;  %1097 = vmatprep.subr.bf16.mxu0 %v1096_v35  ;;  %1119 = vmatprep.subr.bf16.mxu1 %v1096_v35 }
  0x1e   : > { %215 = vst.msk [vmem:[#allocation2 + $0x10] sm:$0xff] %vm212_vm1, %v1409_v8  ;;  %v1416_v9 = vld [vmem:[%s1388_s30 + $0x30] sm:$0xff]  ;;  %v1423_v12 = vld [vmem:[%s1388_s30 + $0x40] sm:$0xff] }
  0x1f   : > { %290 = vrot.lane.b32.xlu1 %v1395_v3, %s1289_s4  ;;  %241 = vrot.lane.b32.xlu0 %v1398_v4, %s1290_s5  ;;  %v1419_v10 = vld [vmem:[%s1388_s30 + $0xb0] sm:$0xff]  ;;  %216 = vst.msk [vmem:[#allocation2 + $0x18] sm:$0xff] %vm212_vm1, %v1416_v9  ;;  %217 = vst.msk [vmem:[#allocation2 + $0x20] sm:$0xff] %vm212_vm1, %v1423_v12  ;;  %v979_v14 = vld [vmem:[%s1388_s30 + $0x121] sm:$0xff] }
  0x20   : > { %v971_v11 = vld [vmem:[%s1388_s30 + $0x1b0] sm:$0xff]  ;;  %v972_v15 = vld [vmem:[%s1388_s30 + $0x1c0] sm:$0xff]  ;;  %1099 = vmatpush3.bf16.msra.mxu0 %v1096_v35  ;;  %1127 = vmatpush3.bf16.msra.mxu1 %v1096_v35 }
  0x21   : > { %v1433_v13 = vld [vmem:[%s1388_s30 + $0x50] sm:$0xff]  ;;  %v1438_v16 = vld [vmem:[%s1388_s30 + $0x60] sm:$0xff]  ;;  %1101 = vmatprep.subr.bf16.mxu0 %v1100_v38  ;;  %1120 = vmatprep.subr.bf16.mxu1 %v1100_v38 }
  0x22   : > { %218 = vst.msk [vmem:[#allocation2 + $0x28] sm:$0xff] %vm212_vm1, %v1433_v13  ;;  %219 = vst.msk [vmem:[#allocation2 + $0x30] sm:$0xff] %vm212_vm1, %v1438_v16  ;;  %v204_v17 = vld [vmem:[%s1388_s30] sm:$0xff]  ;;  %v1449_v18 = vld [vmem:[%s1388_s30 + $0x70] sm:$0xff] }
  0x23   : > { %341 = vrot.lane.b32.xlu1 %v964_v6, %s1291_s6  ;;  %339 = vrot.lane.b32.xlu0 %v963_v7, %s1291_s6  ;;  %213 = vst.msk [vmem:[#allocation2] sm:$0xff] %vm212_vm1, %v204_v17  ;;  %v1452_v19 = vld [vmem:[%s1388_s30 + $0x21] sm:$0xff]  ;;  %220 = vst.msk [vmem:[#allocation2 + $0x38] sm:$0xff] %vm212_vm1, %v1449_v18  ;;  %v980_v29 = vld [vmem:[%s1388_s30 + $0x131] sm:$0xff]  ;;  %vm799_vm1 = vcmask 523716  }
  0x24   : > { %v1455_v20 = vld [vmem:[%s1388_s30 + $0xc0] sm:$0xff]  ;;  %v1492_v34 = vld [vmem:[%s1388_s30 + $0x31] sm:$0xff]  ;;  %1103 = vmatpush3.bf16.msra.mxu0 %v1100_v38  ;;  %1128 = vmatpush3.bf16.msra.mxu1 %v1100_v38 }
  0x25   : > { %v965_v33 = vld [vmem:[%s1388_s30 + $0x140] sm:$0xff]  ;;  %v973_v41 = vld [vmem:[%s1388_s30 + $0x1d0] sm:$0xff]  ;;  %1105 = vmatprep.subr.bf16.mxu0 %v1104_v43  ;;  %1121 = vmatprep.subr.bf16.mxu1 %v1104_v43 }
  0x26   : > { %v966_v42 = vld [vmem:[%s1388_s30 + $0x150] sm:$0xff]  ;;  %v974_v49 = vld [vmem:[%s1388_s30 + $0x1e0] sm:$0xff] }
  0x27   : > { %243 = vrot.lane.b32.xlu1 %v1419_v10, %s1290_s5  ;;  %390 = vrot.lane.b32.xlu0 %v971_v11, %s1292_s7  ;;  %v959_v50 = vld [vmem:[%s1388_s30 + $0xd0] sm:$0xff]  ;;  %v981_v52 = vld [vmem:[%s1388_s30 + $0x141] sm:$0xff] }
  0x28   : > { %1107 = vmatpush3.bf16.msra.mxu0 %v1104_v43  ;;  %1129 = vmatpush3.bf16.msra.mxu1 %v1104_v43  ;;  %v960_v53 = vld [vmem:[%s1388_s30 + $0xe0] sm:$0xff]  ;;  %v982_v55 = vld [vmem:[%s1388_s30 + $0x151] sm:$0xff] }
  0x29   : > { %1109 = vmatprep.subr.bf16.mxu0 %v1108_v46  ;;  %1122 = vmatprep.subr.bf16.mxu1 %v1108_v46  ;;  %v276_v54 = vld [vmem:[%s1388_s30 + $0x41] sm:$0xff]  ;;  %v277_v56 = vld [vmem:[%s1388_s30 + $0x51] sm:$0xff] }
  0x2a   : > { %v967_v57 = vld [vmem:[%s1388_s30 + $0x160] sm:$0xff]  ;;  %v968_v58 = vld [vmem:[%s1388_s30 + $0x170] sm:$0xff] }
  0x2b   : > { %439 = vrot.lane.b32.xlu1 %v979_v14, %s1293_s8  ;;  %392 = vrot.lane.b32.xlu0 %v972_v15, %s1292_s7  ;;  %v975_v59 = vld [vmem:[%s1388_s30 + $0x1f0] sm:$0xff]  ;;  %v976_v61 = vld [vmem:[%s1388_s30 + $0x200] sm:$0xff] }
  0x2c   : > { %1111 = vmatpush3.bf16.msra.mxu0 %v1108_v46  ;;  %1130 = vmatpush3.bf16.msra.mxu1 %v1108_v46  ;;  %v961_v60 = vld [vmem:[%s1388_s30 + $0xf0] sm:$0xff]  ;;  %v983_v62 = vld [vmem:[%s1388_s30 + $0x161] sm:$0xff] }
  0x2d   : > { %1113 = vmatprep.subr.bf16.mxu0 %v1112_v51  ;;  %1123 = vmatprep.subr.bf16.mxu1 %v1112_v51  ;;  %v962_v63 = vld [vmem:[%s1388_s30 + $0x100] sm:$0xff]  ;;  %v984_v1 = vld [vmem:[%s1388_s30 + $0x171] sm:$0xff] }
  0x2e   : > { %v278_v0 = vld [vmem:[%s1388_s30 + $0x61] sm:$0xff]  ;;  %v279_v2 = vld [vmem:[%s1388_s30 + $0x71] sm:$0xff] }
  0x2f   : > { %292 = vrot.lane.b32.xlu1 %v1452_v19, %s1289_s4  ;;  %245 = vrot.lane.b32.xlu0 %v1455_v20, %s1290_s5  ;;  %v978_v6 = vld [vmem:[%s1388_s30 + $0x220] sm:$0xff] }
  0x30   : > { %1115 = vmatpush3.bf16.msra.mxu0 %v1112_v51  ;;  %1131 = vmatpush3.bf16.msra.mxu1 %v1112_v51  ;;  %v985_v7 = vld [vmem:[%s1388_s30 + $0x181] sm:$0xff] }
  0x31   : > { %v1010_v15 = vld [vmem:[%s1388_s30 + $0x81] sm:$0xff] }
  0x33   : > { %491 = vrot.lane.b32.xlu1 %v987_v5, %s1294_s10  ;;  %441 = vrot.lane.b32.xlu0 %v980_v29, %s1293_s8  ;;  %v977_v5 = vld [vmem:[%s1388_s30 + $0x210] sm:$0xff] }
  0x37   : > { %343 = vrot.lane.b32.xlu1 %v965_v33, %s1291_s6  ;;  %294 = vrot.lane.b32.xlu0 %v1492_v34, %s1289_s4 }
  0x3b   : > { %542 = vrot.lane.b32.xlu1 %v1398_v4, %s1295_s29  ;;  %493 = vrot.lane.b32.xlu0 %v1409_v8, %s1294_s10  ;;  %v970_v4 = vld [vmem:[%s1388_s30 + $0x190] sm:$0xff] }
  0x3c   : > { %v986_v8 = vld [vmem:[%s1388_s30 + $0x191] sm:$0xff] }
  0x3f   : > { %394 = vrot.lane.b32.xlu1 %v973_v41, %s1292_s7  ;;  %345 = vrot.lane.b32.xlu0 %v966_v42, %s1291_s6 }
  0x43   : > { %591 = vrot.lane.b32.xlu1 %v1395_v3, %s1296_s28  ;;  %544 = vrot.lane.b32.xlu0 %v1419_v10, %s1295_s29  ;;  %v969_v3 = vld [vmem:[%s1388_s30 + $0x180] sm:$0xff] }
  0x47   : > { %396 = vrot.lane.b32.xlu1 %v974_v49, %s1292_s7  ;;  %247 = vrot.lane.b32.xlu0 %v959_v50, %s1290_s5 }
  0x4b   : > { %593 = vrot.lane.b32.xlu1 %v1452_v19, %s1296_s28  ;;  %443 = vrot.lane.b32.xlu0 %v981_v52, %s1293_s8 }
  0x4f   : > { %249 = vrot.lane.b32.xlu0 %v960_v53, %s1290_s5  ;;  %296 = vrot.lane.b32.xlu1 %v276_v54, %s1289_s4 }
  0x53   : > { %445 = vrot.lane.b32.xlu0 %v982_v55, %s1293_s8  ;;  %495 = vrot.lane.b32.xlu1 %v1416_v9, %s1294_s10  ;;  %v994_v9 = vld [vmem:[%s1388_s30 + $0x80] sm:$0xff] }
  0x57   : > { %298 = vrot.lane.b32.xlu0 %v277_v56, %s1289_s4  ;;  %347 = vrot.lane.b32.xlu1 %v967_v57, %s1291_s6 }
  0x5b   : > { %497 = vrot.lane.b32.xlu0 %v1423_v12, %s1294_s10  ;;  %546 = vrot.lane.b32.xlu1 %v1455_v20, %s1295_s29  ;;  %v1002_v12 = vld [vmem:[%s1388_s30 + $0x110] sm:$0xff]  ;;  %s178_s30 = sand.u32 1, %s1270_s13  }
  0x5c   : > { %s846_s15 = scalar_lea.sflag [#allocation4], %s178_s30 }
  0x5f   : > { %349 = vrot.lane.b32.xlu0 %v968_v58, %s1291_s6  ;;  %398 = vrot.lane.b32.xlu1 %v975_v59, %s1292_s7 }
  0x63   : > { %548 = vrot.lane.b32.xlu0 %v959_v50, %s1295_s29  ;;  %595 = vrot.lane.b32.xlu1 %v1492_v34, %s1296_s28 }
  0x67   : > { %251 = vrot.lane.b32.xlu0 %v961_v60, %s1290_s5  ;;  %400 = vrot.lane.b32.xlu1 %v976_v61, %s1292_s7 }
  0x6b   : > { %447 = vrot.lane.b32.xlu0 %v983_v62, %s1293_s8  ;;  %597 = vrot.lane.b32.xlu1 %v276_v54, %s1296_s28 }
  0x6f   : > { %253 = vrot.lane.b32.xlu0 %v962_v63, %s1290_s5  ;;  %300 = vrot.lane.b32.xlu1 %v278_v0, %s1289_s4 }
  0x73   : > { %449 = vrot.lane.b32.xlu0 %v984_v1, %s1293_s8  ;;  %499 = vrot.lane.b32.xlu1 %v1433_v13, %s1294_s10 }
  0x77   : > { %302 = vrot.lane.b32.xlu0 %v279_v2, %s1289_s4  ;;  %351 = vrot.lane.b32.xlu1 %v969_v3, %s1291_s6 }
  0x7b   : > { %501 = vrot.lane.b32.xlu0 %v1438_v16, %s1294_s10  ;;  %550 = vrot.lane.b32.xlu1 %v960_v53, %s1295_s29 }
  0x7f   : > { %353 = vrot.lane.b32.xlu0 %v970_v4, %s1291_s6  ;;  %402 = vrot.lane.b32.xlu1 %v977_v5, %s1292_s7 }
  0x83   : > { %552 = vrot.lane.b32.xlu0 %v961_v60, %s1295_s29  ;;  %599 = vrot.lane.b32.xlu1 %v277_v56, %s1296_s28 }
  0x87   : > { %404 = vrot.lane.b32.xlu0 %v978_v6, %s1292_s7  ;;  %451 = vrot.lane.b32.xlu1 %v985_v7, %s1293_s8 }
  0x8b   : > { %601 = vrot.lane.b32.xlu0 %v278_v0, %s1296_s28  ;;  %453 = vrot.lane.b32.xlu1 %v986_v8, %s1293_s8  ;;  %s952_s8 = sshll.u32 %s178_s30, 2 }
  0x8d   : > { %v289_v10 = vpop.permute.xlu1 %288  ;;  %v240_v11 = vpop.permute.xlu0 %239 }
  0x8e   : > { %264 = vst.msk [vmem:[#allocation2] sm:$0xff] %vm263_vm2, %v240_v11 }
  0x8f   : > { %503 = vrot.lane.b32.xlu0 %v1449_v18, %s1294_s10  ;;  %505 = vrot.lane.b32.xlu1 %v994_v9, %s1294_s10  ;;  %313 = vst.msk [vmem:[#allocation2] sm:$0xff] %vm312_vm3, %v289_v10 }
  0x91   : > { %v291_v13 = vpop.permute.xlu1 %290  ;;  %v242_v14 = vpop.permute.xlu0 %241 }
  0x92   : > { %265 = vst.msk [vmem:[#allocation2 + $0x8] sm:$0xff] %vm263_vm2, %v242_v14 }
  0x93   : > { %314 = vst.msk [vmem:[#allocation2 + $0x8] sm:$0xff] %vm312_vm3, %v291_v13  ;;  %554 = vrot.lane.b32.xlu0 %v962_v63, %s1295_s29  ;;  %556 = vrot.lane.b32.xlu1 %v1002_v12, %s1295_s29  ;;  %s1681_s29 = scalar_lea.vmem [#allocation3], %s952_s8 }
  0x94   : > { %s860_s5 = sshll.u32 %s1681_s29, 4  ;;  %s1706_s5 = int_to_ptr.vmem [resolvable:$true] %s860_s5 }
  0x95   : > { %v342_v16 = vpop.permute.xlu1 %341  ;;  %v340_v17 = vpop.permute.xlu0 %339 }
  0x96   : > { %365 = vst.msk [vmem:[#allocation2 + $0x8] sm:$0xff] %vm363_vm4, %v342_v16  ;;  %364 = vst.msk [vmem:[#allocation2] sm:$0xff] %vm363_vm4, %v340_v17 }
  0x97   : > { %603 = vrot.lane.b32.xlu0 %v279_v2, %s1296_s28  ;;  %605 = vrot.lane.b32.xlu1 %v1010_v15, %s1296_s28 }
  0x99   : > { %v244_v18 = vpop.permute.xlu1 %243  ;;  %v391_v19 = vpop.permute.xlu0 %390 }
  0x9a   : > { %266 = vst.msk [vmem:[#allocation2 + $0x10] sm:$0xff] %vm263_vm2, %v244_v18 }
  0x9b   : > { %415 = vst.msk [vmem:[#allocation2] sm:$0xff] %vm414_vm5, %v391_v19 }
  0x9d   : > { %v440_v20 = vpop.permute.xlu1 %439  ;;  %v393_v21 = vpop.permute.xlu0 %392 }
  0x9e   : > { %464 = vst.msk [vmem:[#allocation2] sm:$0xff] %vm463_vm6, %v440_v20  ;;  %v1011_v20 = vld [vmem:[%s1757_s2] ss:$0 sm:$0xff] }
  0x9f   : > { %416 = vst.msk [vmem:[#allocation2 + $0x8] sm:$0xff] %vm414_vm5, %v393_v21 }
  0xa1   : > { %v293_v22 = vpop.permute.xlu1 %292  ;;  %v246_v23 = vpop.permute.xlu0 %245 }
  0xa2   : > { %315 = vst.msk [vmem:[#allocation2 + $0x10] sm:$0xff] %vm312_vm3, %v293_v22 }
  0xa3   : > { %267 = vst.msk [vmem:[#allocation2 + $0x18] sm:$0xff] %vm263_vm2, %v246_v23 }
  0xa5   : > { %v492_v24 = vpop.permute.xlu1 %491  ;;  %v442_v25 = vpop.permute.xlu0 %441 }
  0xa6   : > { %516 = vst.msk [vmem:[#allocation2] sm:$0xff] %vm515_vm7, %v492_v24 }
  0xa7   : > { %465 = vst.msk [vmem:[#allocation2 + $0x8] sm:$0xff] %vm463_vm6, %v442_v25 }
  0xa9   : > { %v344_v26 = vpop.permute.xlu1 %343  ;;  %v295_v27 = vpop.permute.xlu0 %294 }
  0xaa   : > { %366 = vst.msk [vmem:[#allocation2 + $0x10] sm:$0xff] %vm363_vm4, %v344_v26 }
  0xab   : > { %316 = vst.msk [vmem:[#allocation2 + $0x18] sm:$0xff] %vm312_vm3, %v295_v27 }
  0xad   : > { %v543_v28 = vpop.permute.xlu1 %542  ;;  %v494_v29 = vpop.permute.xlu0 %493 }
  0xae   : > { %567 = vst.msk [vmem:[#allocation2] sm:$0xff] %vm566_vm8, %v543_v28 }
  0xaf   : > { %517 = vst.msk [vmem:[#allocation2 + $0x8] sm:$0xff] %vm515_vm7, %v494_v29 }
  0xb1   : > { %v395_v30 = vpop.permute.xlu1 %394  ;;  %v346_v31 = vpop.permute.xlu0 %345 }
  0xb2   : > { %417 = vst.msk [vmem:[#allocation2 + $0x10] sm:$0xff] %vm414_vm5, %v395_v30 }
  0xb3   : > { %367 = vst.msk [vmem:[#allocation2 + $0x18] sm:$0xff] %vm363_vm4, %v346_v31 }
  0xb5   : > { %v592_v32 = vpop.permute.xlu1 %591  ;;  %v545_v33 = vpop.permute.xlu0 %544 }
  0xb6   : > { %616 = vst.msk [vmem:[#allocation2] sm:$0xff] %vm615_vm9, %v592_v32 }
  0xb7   : > { %568 = vst.msk [vmem:[#allocation2 + $0x8] sm:$0xff] %vm566_vm8, %v545_v33 }
  0xb9   : > { %v397_v34 = vpop.permute.xlu1 %396  ;;  %v248_v35 = vpop.permute.xlu0 %247 }
  0xba   : > { %418 = vst.msk [vmem:[#allocation2 + $0x18] sm:$0xff] %vm414_vm5, %v397_v34 }
  0xbb   : > { %268 = vst.msk [vmem:[#allocation2 + $0x20] sm:$0xff] %vm263_vm2, %v248_v35 }
  0xbd   : > { %v594_v36 = vpop.permute.xlu1 %593  ;;  %v444_v37 = vpop.permute.xlu0 %443  ;;  %v624_v38 = vld [vmem:[#allocation2] sm:$0xff] }
  0xbe   : > { %617 = vst.msk [vmem:[#allocation2 + $0x8] sm:$0xff] %vm615_vm9, %v594_v36  ;;  %1072 = vmatprep.mubr.f32.mxu0 %v624_v38 }
  0xbf   : > { %466 = vst.msk [vmem:[#allocation2 + $0x10] sm:$0xff] %vm463_vm6, %v444_v37 }
  0xc1   : > { %v250_v39 = vpop.permute.xlu0 %249  ;;  %v297_v40 = vpop.permute.xlu1 %296 }
  0xc2   : > { %269 = vst.msk [vmem:[#allocation2 + $0x28] sm:$0xff] %vm263_vm2, %v250_v39 }
  0xc3   : > { %317 = vst.msk [vmem:[#allocation2 + $0x20] sm:$0xff] %vm312_vm3, %v297_v40 }
  0xc5   : > { %v446_v41 = vpop.permute.xlu0 %445  ;;  %v625_v42 = vld [vmem:[#allocation2 + $0x8] sm:$0xff]  ;;  %v496_v43 = vpop.permute.xlu1 %495 }
  0xc6   : > { %467 = vst.msk [vmem:[#allocation2 + $0x18] sm:$0xff] %vm463_vm6, %v446_v41  ;;  %1073 = vmatmul.mubr.f32.vlgmr.msra.gmra.mrb[0].mxu0 %v625_v42 }
  0xc7   : > { %518 = vst.msk [vmem:[#allocation2 + $0x10] sm:$0xff] %vm515_vm7, %v496_v43 }
  0xc9   : > { %v299_v44 = vpop.permute.xlu0 %298  ;;  %v348_v45 = vpop.permute.xlu1 %347 }
  0xca   : > { %318 = vst.msk [vmem:[#allocation2 + $0x28] sm:$0xff] %vm312_vm3, %v299_v44 }
  0xcb   : > { %368 = vst.msk [vmem:[#allocation2 + $0x20] sm:$0xff] %vm363_vm4, %v348_v45 }
  0xcd   : > { %v498_v46 = vpop.permute.xlu0 %497  ;;  %v547_v47 = vpop.permute.xlu1 %546 }
  0xce   : > { %519 = vst.msk [vmem:[#allocation2 + $0x18] sm:$0xff] %vm515_vm7, %v498_v46 }
  0xcf   : > { %569 = vst.msk [vmem:[#allocation2 + $0x10] sm:$0xff] %vm566_vm8, %v547_v47 }
  0xd1   : > { %v350_v48 = vpop.permute.xlu0 %349  ;;  %v399_v49 = vpop.permute.xlu1 %398 }
  0xd2   : > { %369 = vst.msk [vmem:[#allocation2 + $0x28] sm:$0xff] %vm363_vm4, %v350_v48 }
  0xd3   : > { %419 = vst.msk [vmem:[#allocation2 + $0x20] sm:$0xff] %vm414_vm5, %v399_v49 }
  0xd5   : > { %v549_v50 = vpop.permute.xlu0 %548  ;;  %v596_v51 = vpop.permute.xlu1 %595 }
  0xd6   : > { %570 = vst.msk [vmem:[#allocation2 + $0x18] sm:$0xff] %vm566_vm8, %v549_v50 }
  0xd7   : > { %618 = vst.msk [vmem:[#allocation2 + $0x10] sm:$0xff] %vm615_vm9, %v596_v51 }
  0xd9   : > { %v252_v52 = vpop.permute.xlu0 %251  ;;  %v401_v53 = vpop.permute.xlu1 %400 }
  0xda   : > { %270 = vst.msk [vmem:[#allocation2 + $0x30] sm:$0xff] %vm263_vm2, %v252_v52 }
  0xdb   : > { %420 = vst.msk [vmem:[#allocation2 + $0x28] sm:$0xff] %vm414_vm5, %v401_v53 }
  0xdd   : > { %v448_v54 = vpop.permute.xlu0 %447  ;;  %v598_v55 = vpop.permute.xlu1 %597 }
  0xde   : > { %v626_v56 = vld [vmem:[#allocation2 + $0x10] sm:$0xff]  ;;  %468 = vst.msk [vmem:[#allocation2 + $0x20] sm:$0xff] %vm463_vm6, %v448_v54 }
  0xdf   : > { %619 = vst.msk [vmem:[#allocation2 + $0x18] sm:$0xff] %vm615_vm9, %v598_v55  ;;  %1075 = vmatprep.mubr.f32.mxu0 %v626_v56 }
  0xe1   : > { %v254_v57 = vpop.permute.xlu0 %253  ;;  %v301_v58 = vpop.permute.xlu1 %300 }
  0xe2   : > { %271 = vst.msk [vmem:[#allocation2 + $0x38] sm:$0xff] %vm263_vm2, %v254_v57  ;;  %vm805_vm2 = vcmask 585216  }
  0xe3   : > { %319 = vst.msk [vmem:[#allocation2 + $0x30] sm:$0xff] %vm312_vm3, %v301_v58 }
  0xe5   : > { %v450_v59 = vpop.permute.xlu0 %449  ;;  %v500_v60 = vpop.permute.xlu1 %499 }
  0xe6   : > { %v627_v61 = vld [vmem:[#allocation2 + $0x18] sm:$0xff]  ;;  %469 = vst.msk [vmem:[#allocation2 + $0x28] sm:$0xff] %vm463_vm6, %v450_v59 }
  0xe7   : > { %520 = vst.msk [vmem:[#allocation2 + $0x20] sm:$0xff] %vm515_vm7, %v500_v60  ;;  %1076 = vmatmul.mubr.f32.gmra.mrb[2].mxu0 %v627_v61 }
  0xe9   : > { %v303_v62 = vpop.permute.xlu0 %302  ;;  %v352_v63 = vpop.permute.xlu1 %351 }
  0xea   : > { %320 = vst.msk [vmem:[#allocation2 + $0x38] sm:$0xff] %vm312_vm3, %v303_v62  ;;  %vm810_vm3 = vcmask 654916  }
  0xeb   : > { %370 = vst.msk [vmem:[#allocation2 + $0x30] sm:$0xff] %vm363_vm4, %v352_v63 }
  0xed   : > { %v502_v0 = vpop.permute.xlu0 %501  ;;  %v551_v1 = vpop.permute.xlu1 %550 }
  0xee   : > { %521 = vst.msk [vmem:[#allocation2 + $0x28] sm:$0xff] %vm515_vm7, %v502_v0 }
  0xef   : > { %571 = vst.msk [vmem:[#allocation2 + $0x20] sm:$0xff] %vm566_vm8, %v551_v1 }
  0xf1   : > { %v354_v2 = vpop.permute.xlu0 %353  ;;  %v403_v3 = vpop.permute.xlu1 %402 }
  0xf2   : > { %371 = vst.msk [vmem:[#allocation2 + $0x38] sm:$0xff] %vm363_vm4, %v354_v2  ;;  %vm816_vm4 = vcmask 716416  }
  0xf3   : > { %421 = vst.msk [vmem:[#allocation2 + $0x30] sm:$0xff] %vm414_vm5, %v403_v3 }
  0xf5   : > { %v553_v4 = vpop.permute.xlu0 %552  ;;  %v600_v5 = vpop.permute.xlu1 %599 }
  0xf6   : > { %572 = vst.msk [vmem:[#allocation2 + $0x28] sm:$0xff] %vm566_vm8, %v553_v4 }
  0xf7   : > { %620 = vst.msk [vmem:[#allocation2 + $0x20] sm:$0xff] %vm615_vm9, %v600_v5 }
  0xf9   : > { %v405_v6 = vpop.permute.xlu0 %404  ;;  %v452_v7 = vpop.permute.xlu1 %451 }
  0xfa   : > { %422 = vst.msk [vmem:[#allocation2 + $0x38] sm:$0xff] %vm414_vm5, %v405_v6  ;;  %vm821_vm5 = vcmask 786116  }
  0xfb   : > { %470 = vst.msk [vmem:[#allocation2 + $0x30] sm:$0xff] %vm463_vm6, %v452_v7 }
  0xfd   : > { %v602_v8 = vpop.permute.xlu0 %601  ;;  %v454_v9 = vpop.permute.xlu1 %453 }
  0xfe   : > { %v628_v10 = vld [vmem:[#allocation2 + $0x20] sm:$0xff]  ;;  %621 = vst.msk [vmem:[#allocation2 + $0x28] sm:$0xff] %vm615_vm9, %v602_v8 }
  0xff   : > { %471 = vst.msk [vmem:[#allocation2 + $0x38] sm:$0xff] %vm463_vm6, %v454_v9  ;;  %1078 = vmatprep.mubr.f32.mxu1 %v628_v10  ;;  %vm827_vm6 = vcmask 847616  }
 0x101   : > { %v504_v11 = vpop.permute.xlu0 %503  ;;  %v506_v12 = vpop.permute.xlu1 %505 }
 0x102   : > { %522 = vst.msk [vmem:[#allocation2 + $0x30] sm:$0xff] %vm515_vm7, %v504_v11  ;;  %523 = vst.msk [vmem:[#allocation2 + $0x38] sm:$0xff] %vm515_vm7, %v506_v12  ;;  %vm832_vm7 = vcmask 917316  }
 0x105   : > { %v629_v13 = vld [vmem:[#allocation2 + $0x28] sm:$0xff]  ;;  %v555_v14 = vpop.permute.xlu0 %554  ;;  %v557_v15 = vpop.permute.xlu1 %556 }
 0x106   : > { %1079 = vmatmul.mubr.f32.vlgmr.msra.gmra.mrb[0].mxu1 %v629_v13  ;;  %573 = vst.msk [vmem:[#allocation2 + $0x30] sm:$0xff] %vm566_vm8, %v555_v14  ;;  %574 = vst.msk [vmem:[#allocation2 + $0x38] sm:$0xff] %vm566_vm8, %v557_v15  ;;  %vm838_vm8 = vcmask 978816  }
 0x109   : > { %v604_v16 = vpop.permute.xlu0 %603  ;;  %v606_v17 = vpop.permute.xlu1 %605 }
 0x10a   : > { %622 = vst.msk [vmem:[#allocation2 + $0x30] sm:$0xff] %vm615_vm9, %v604_v16  ;;  %623 = vst.msk [vmem:[#allocation2 + $0x38] sm:$0xff] %vm615_vm9, %v606_v17  ;;  %vm843_vm9 = vcmask 1048516  }
 0x111   : > { %v630_v18 = vld [vmem:[#allocation2 + $0x30] sm:$0xff]  ;;  %v631_v19 = vld [vmem:[#allocation2 + $0x38] sm:$0xff] }
 0x112   : > { %1081 = vmatprep.mubr.f32.mxu1 %v630_v18 }
 0x113   : > { %1082 = vmatmul.mubr.f32.gmra.mrb[2].mxu1 %v631_v19 }
 0x199   : > { %v1074_v21 = vpop.f32.mrb[0].mxu0 }
 0x19a   : > { %v727_v22 = vadd.f32 %v1074_v21, %v1011_v20  ;;  %v721_v23 = vpop.f32.mrb[1].mxu0 }
 0x19b   : > { %v722_v24 = vadd.f32 %v1011_v20, %v721_v23 }
 0x19c   : > { %774 = vrot.lane.b32.xlu0 %v727_v22, %s1294_s10  ;;  %769 = vrot.lane.b32.xlu1 %v727_v22, %s1292_s7  ;;  %s1300_s10 = smov 56   ;;  %s1301_s7 = smov 40  }
 0x19d   : > { %761 = vst.msk [vmem:[%s1681_s29] sm:$0xf] %vm760_vm10, %v722_v24 }
 0x1a0   : > { %763 = vrot.lane.b32.xlu0 %v722_v24, %s1289_s4  ;;  %s1302_s4 = smov 80  }
 0x1ba   : > { %v1077_v25 = vpop.f32.mrb[2].mxu0 }
 0x1bb   : > { %v731_v26 = vpop.f32.mrb[3].mxu0  ;;  %v737_v30 = vadd.f32 %v1077_v25, %v1011_v20 }
 0x1bc   : > { %v732_v31 = vadd.f32 %v1011_v20, %v731_v26 }
 0x1d9   : > { %v1080_v27 = vpop.f32.mrb[0].mxu1 }
 0x1da   : > { %v741_v28 = vpop.f32.mrb[1].mxu1  ;;  %v747_v33 = vadd.f32 %v1080_v27, %v1011_v20 }
 0x1db   : > { %v742_v29 = vadd.f32 %v1011_v20, %v741_v28 }
 0x1dd   : > { %802 = vrot.lane.b32.xlu1 %v742_v29, %s1297_s21  ;;  %807 = vrot.lane.b32.xlu0 %v742_v29, %s1298_s23  ;;  %s1704_s21 = scalar_lea.hbm %s1758_s3, %s1013_s19  ;;  %s1208_s23 = scalar_lea.vmem %s1706_s5, 64 }
 0x1de   : > { %p1209_p12 = scmp.ne.s32.totalorder %s1706_s5, %s1208_s23 }
 0x1e0   : > { %p1210_p13 = pnand %p1209_p12, %p1369_p4 }
 0x1e1   : > { %791 = vrot.lane.b32.xlu1 %v737_v30, %s1299_s26  ;;  %796 = vrot.lane.b32.xlu0 %v737_v30, %s1300_s10  ;;  %s1308_s26 = smov [#allocation3]  }
 0x1e2   : > { %p1211_p0 = pneg %p1210_p13  ;;  %s1212_s10 = sshll.u32 %s1308_s26, 4  ;;  %s1213_s10 = int_to_ptr.vmem [resolvable:$false] %s1212_s10 }
 0x1e3   : > { %p1215_p1 = scmp.lt.s32.totalorder %s1706_s5, %s1213_s10 }
 0x1e5   : > { %780 = vrot.lane.b32.xlu1 %v732_v31, %s1296_s28  ;;  %785 = vrot.lane.b32.xlu0 %v732_v31, %s1301_s7  ;;  %s1307_s28 = smov 120   ;;  %s1214_s7 = scalar_lea.vmem %s1213_s10, 128 }
 0x1e6   : > { %v1083_v32 = vpop.f32.mrb[2].mxu1  ;;  %p1216_p2 = scmp.lt.s32.totalorder %s1214_s7, %s1208_s23 }
 0x1e7   : > { %v751_v34 = vpop.f32.mrb[3].mxu1  ;;  %v757_v36 = vadd.f32 %v1083_v32, %v1011_v20 }
 0x1e8   : > { %v752_v35 = vadd.f32 %v1011_v20, %v751_v34  ;;  %p1217_p3 = por %p1216_p2, %p1215_p1 }
 0x1e9   : > { %813 = vrot.lane.b32.xlu1 %v747_v33, %s1302_s4  ;;  %818 = vrot.lane.b32.xlu0 %v747_v33, %s1303_s27 }
 0x1ea   : > { %p1218_p5 = pnand %p1217_p3, %p1211_p0 }
 0x1ed   : > { %824 = vrot.lane.b32.xlu1 %v752_v35, %s1304_s9  ;;  %829 = vrot.lane.b32.xlu0 %v752_v35, %s1305_s11 }
 0x1f1   : > { %835 = vrot.lane.b32.xlu1 %v757_v36, %s1306_s18  ;;  %840 = vrot.lane.b32.xlu0 %v757_v36, %s1307_s28 }
 0x20e   : > { %v775_v37 = vpop.permute.xlu0 %774  ;;  %v770_v38 = vpop.permute.xlu1 %769 }
 0x212   : > { %v764_v39 = vpop.permute.xlu0 %763 }
 0x213   : > { %767 = vst.msk [vmem:[%s1681_s29 - $0x4] sm:$0xf0] %vm766_vm11, %v764_v39 }
 0x214   : > { %773 = vst.msk [vmem:[%s1681_s29] sm:$0xf] %vm772_vm12, %v770_v38 }
 0x215   : > { %778 = vst.msk [vmem:[%s1681_s29 - $0x4] sm:$0xf0] %vm777_vm13, %v775_v37 }
 0x24f   : > { %v803_v40 = vpop.permute.xlu1 %802  ;;  %v808_v41 = vpop.permute.xlu0 %807 }
 0x253   : > { %v792_v42 = vpop.permute.xlu1 %791  ;;  %v797_v43 = vpop.permute.xlu0 %796 }
 0x257   : > { %v781_v44 = vpop.permute.xlu1 %780  ;;  %v786_v45 = vpop.permute.xlu0 %785 }
 0x258   : > { %784 = vst.msk [vmem:[%s1681_s29] sm:$0xf] %vm783_vm14, %v781_v44 }
 0x259   : > { %789 = vst.msk [vmem:[%s1681_s29 - $0x4] sm:$0xf0] %vm788_vm15, %v786_v45 }
 0x25a   : > { %795 = vst.msk [vmem:[%s1681_s29] sm:$0xf] %vm794_vm0, %v792_v42 }
 0x25b   : > { %800 = vst.msk [vmem:[%s1681_s29 - $0x4] sm:$0xf0] %vm799_vm1, %v797_v43  ;;  %v814_v46 = vpop.permute.xlu1 %813  ;;  %v819_v47 = vpop.permute.xlu0 %818 }
 0x25c   : > { %806 = vst.msk [vmem:[%s1681_s29] sm:$0xf] %vm805_vm2, %v803_v40 }
 0x25d   : > { %811 = vst.msk [vmem:[%s1681_s29 - $0x4] sm:$0xf0] %vm810_vm3, %v808_v41 }
 0x25e   : > { %817 = vst.msk [vmem:[%s1681_s29] sm:$0xf] %vm816_vm4, %v814_v46 }
 0x25f   : > { %822 = vst.msk [vmem:[%s1681_s29 - $0x4] sm:$0xf0] %vm821_vm5, %v819_v47  ;;  %v825_v48 = vpop.permute.xlu1 %824  ;;  %v830_v49 = vpop.permute.xlu0 %829 }
 0x260   : > { %828 = vst.msk [vmem:[%s1681_s29] sm:$0xf] %vm827_vm6, %v825_v48 }
 0x261   : > { %833 = vst.msk [vmem:[%s1681_s29 - $0x4] sm:$0xf0] %vm832_vm7, %v830_v49 }
 0x263   : > { %v836_v50 = vpop.permute.xlu1 %835  ;;  %v841_v51 = vpop.permute.xlu0 %840 }
 0x264   : > { %839 = vst.msk [vmem:[%s1681_s29] sm:$0xf] %vm838_vm8, %v836_v50 }
 0x265   : > { %844 = vst.msk [vmem:[%s1681_s29 - $0x4] sm:$0xf0] %vm843_vm9, %v841_v51 }
 0x266   : > { %1221 = shalt.err (!%p1218_p5)
}
 0x267   : > { %s1222_s30 = scalar_lea.hbm %s1704_s21, 64  ;;  %s1226_s27 = scalar_lea.hbm %s1758_s3, 128 }
 0x268   : > { %p1223_p6 = scmp.ne.s32.totalorder %s1704_s21, %s1222_s30  ;;  %p1227_p10 = scmp.lt.u32.totalorder %s1704_s21, %s1758_s3 }
 0x269   : > { %p1228_p11 = scmp.lt.u32.totalorder %s1226_s27, %s1222_s30  ;;  %p1230_p13 = scmp.lt.u32.totalorder %s1222_s30, %s1704_s21 }
 0x26a   : > { %p1224_p7 = pnand %p1223_p6, %p1369_p4 }
 0x26b   : > { %p1229_p12 = por %p1228_p11, %p1227_p10 }
 0x26c   : > { %p1225_p9 = pneg %p1224_p7 }
 0x26d   : > { %p1231_p0 = por %p1230_p13, %p1229_p12 }
 0x26f   : > { %p1232_p1 = pnand %p1231_p0, %p1225_p9 }
 0x271   : > { %1235 = shalt.err (!%p1232_p1)
}
 0x272   : > { %1133 = dma.vmem_to_hbm [thread:$0]  (%p1369_p4), %s1706_s5, 64, %s1704_s21, %s846_s15  }
 0x273 PF: > { %p1139_p2 = scmp.ge.s32.totalorder %s1286_s17, 2  ;;  %s872_s18 = sand.u32 1, %s1266_s12  }
 0x274   : > { %s873_s28 = scalar_lea.sflag [#allocation4], %s872_s18 }
 0x275   : > { %p1136_p3 = pnand %p1139_p2, %p1376_p8 }
 0x277   : > { %1261 = dma.done.wait (!%p1136_p3), %s873_s28, 64  }
 0x278   : > { %1263 = vsyncadd (!%p1136_p3), %s873_s28, 4294967232  ;;  %s16_s17 = sadd.s32 1, %s1286_s17   ;;  %s1761_s12 = smov %s1270_s13 }
 0x279   : > { %p13_p5 = scmp.ge.s32.totalorder %s16_s17, 4   ;;  %s1762_s13 = smov %s1274_s14 }
 0x27a   : > { %s1763_s14 = smov %s1382_s25  ;;  %s1764_s15 = smov %s1282_s16 }
 0x27b   : > { %s1765_s16 = smov %s1767_s20  ;;  %15 = sbr.rel (!%p13_p5) target bundleno = 4 (0x4), region = 77 }
 0x282   :  { %878 = vsyncpa [#allocation4], 1 }
 0x283   :  { %880 = vsyncpa [#allocation4 + $0x1], 1 }

</bundles_post_ra>
